<compile_context>
chip_gen: v5e
topology: v5e:2x2
jax: 0.10.0
libtpu: 0.0.40
codegen_flags: <defaults>
</compile_context>

<pallas_src>
import functools

import jax
import jax.numpy as jnp
from jax import lax
from jax.experimental import pallas as pl
from jax.experimental.pallas import tpu as pltpu


def _pwca_kernel(z_ref, x_ref, out_ref, *, c_corr, cat, batched):
    # batched: z_ref (bb, C, C_corr), x_ref (bb, C, T), out_ref (bb, C_out, T)
    # squeezed: z_ref (C, C_corr),    x_ref (C, T),     out_ref (C_out, T)
    z = z_ref[...]
    x = x_ref[...]
    if batched:
        # (bb, C, C_corr) x (bb, C, T) -> (bb, C_corr, T), contract over C.
        corr = lax.dot_general(
            z, x,
            dimension_numbers=(((1,), (1,)), ((0,), (0,))),
            preferred_element_type=jnp.float32,
        )
    else:
        # (C, C_corr) x (C, T) -> (C_corr, T), contract over C.
        corr = lax.dot_general(
            z, x,
            dimension_numbers=(((0,), (0,)), ((), ())),
            preferred_element_type=jnp.float32,
        )
    if cat:
        # Fused torch.cat([corr, x], dim=1): x rides the already-resident
        # VMEM block straight into the output tile.
        if batched:
            out_ref[:, :c_corr, :] = corr.astype(out_ref.dtype)
            out_ref[:, c_corr:, :] = x.astype(out_ref.dtype)
        else:
            out_ref[:c_corr, :] = corr.astype(out_ref.dtype)
            out_ref[c_corr:, :] = x.astype(out_ref.dtype)
    else:
        out_ref[...] = corr.astype(out_ref.dtype)


def _pick_tile_hw(hw):
    """Choose the HW (lane) tile length.

    Must be a multiple of 128 that divides hw, or hw itself (full extent is
    always legal).  Prefer >=2 tiles of >=512 lanes (pipelining + both v7x
    TensorCores busy at B=1) but never drop below 512 lanes per tile (small
    tiles fall off the HBM roofline).
    """
    if hw % 128 != 0:
        return hw  # full-extent last dim; at most one masked tail store
    divisors = [d for d in range(128, hw + 1, 128) if hw % d == 0]
    good = [d for d in divisors if 512 <= d <= 2048 and hw // d >= 2]
    if good:
        return max(good)
    capped = [d for d in divisors if d <= 2048]
    return max(capped) if capped else hw


def fear_pwca(z, x, *, cat=False, out_dtype=None, block_b=None, block_hw=None):
    """Pallas implementation of FEAR_PWCA.forward (pixel-wise correlation).

    z: (B, C, Hz, Wz), x: (B, C, H, W).
    Returns (B, Hz*Wz, H, W) or, with cat=True, (B, Hz*Wz + C, H, W).
    """
    b, c, hz, wz = z.shape
    bx, cx, h, w = x.shape
    assert b == bx and c == cx, "z and x must share batch and channel dims"
    c_corr = hz * wz
    hw = h * w
    c_out = c_corr + c if cat else c_corr
    if out_dtype is None:
        out_dtype = x.dtype

    # Glue reshapes only (no transpose of z, no padding, no extra HBM passes).
    z_mat = z.reshape(b, c, c_corr)   # (B, C, C_corr)
    x_mat = x.reshape(b, c, hw)       # (B, C, HW)

    tile_hw = int(block_hw) if block_hw is not None else _pick_tile_hw(hw)
    assert tile_hw == hw or (hw % tile_hw == 0 and tile_hw % 128 == 0)
    n_hw = hw // tile_hw

    in_itemsize = max(jnp.dtype(z.dtype).itemsize, jnp.dtype(x.dtype).itemsize)
    out_itemsize = jnp.dtype(out_dtype).itemsize

    # Double-buffered VMEM bytes per batch element per grid step.
    per_b_bytes = (2 * in_itemsize * c * c_corr
                   + 2 * in_itemsize * c * tile_hw
                   + 2 * out_itemsize * c_out * tile_hw)

    vmem_limit = 32 * 1024 * 1024      # safe vs v5e scoped default & v7x 64 MiB
    block_budget = vmem_limit // 2     # headroom for Mosaic internal scratch

    if block_b is None:
        vmem_cap = max(1, block_budget // max(1, per_b_bytes))
        # ~2 MiB of x-block DMA per grid step keeps the DMA engine streaming.
        dma_cap = max(1, (2 * 1024 * 1024) // max(1, in_itemsize * c * tile_hw))
        # Aim for >= 8 total grid steps (>= 4 per TensorCore on v7x).
        steps_b = max(1, pl.cdiv(8, n_hw))
        step_cap = max(1, pl.cdiv(b, steps_b))
        block_b = max(1, min(b, vmem_cap, dma_cap, step_cap))
    block_b = int(max(1, min(block_b, b)))
    # Avoid batch padding (an extra HBM pass): shrink to a divisor of B.
    while b % block_b != 0:
        block_b -= 1

    # If even a single mandatory block does not fit the default budget
    # (very large C*HW), raise the scoped VMEM limit instead of failing.
    need = per_b_bytes * block_b
    if need + 4 * 1024 * 1024 > vmem_limit:
        vmem_limit = need + 8 * 1024 * 1024

    batched = block_b > 1
    lead = block_b if batched else pl.Squeezed()

    grid = (b // block_b, n_hw)

    grid_spec = pltpu.PrefetchScalarGridSpec(
        num_scalar_prefetch=0,
        grid=grid,
        in_specs=[
            # z is tiny and independent of the HW-tile axis: identical block
            # index across j keeps it resident in VMEM (no re-DMA per tile).
            pl.BlockSpec((lead, c, c_corr), lambda i, j: (i, 0, 0)),
            pl.BlockSpec((lead, c, tile_hw), lambda i, j: (i, 0, j)),
        ],
        out_specs=pl.BlockSpec((lead, c_out, tile_hw), lambda i, j: (i, 0, j)),
    )

    kernel = functools.partial(_pwca_kernel, c_corr=c_corr, cat=cat,
                               batched=batched)

    out = pl.pallas_call(
        kernel,
        out_shape=jax.ShapeDtypeStruct((b, c_out, hw), out_dtype),
        grid_spec=grid_spec,
        compiler_params=pltpu.CompilerParams(
            dimension_semantics=("parallel", "parallel"),
            vmem_limit_bytes=int(vmem_limit)),
    )(z_mat, x_mat)

    return out.reshape(b, c_out, h, w)


def reference(z, x, cat=False):
    """Pure-JAX reference replicating pixel_corr_mat / FEAR_PWCA.forward."""
    b, c, h, w = x.shape
    z_mat = jnp.transpose(z.reshape(b, c, -1), (0, 2, 1))   # (B, Hz*Wz, C)
    x_mat = x.reshape(b, c, -1)                              # (B, C, HW)
    corr = jnp.matmul(z_mat, x_mat).reshape(b, -1, h, w)
    if cat:
        return jnp.concatenate([corr, x], axis=1)
    return corr


if __name__ == "__main__":
    key = jax.random.PRNGKey(0)
    k_z, k_x, k_z2, k_x2 = jax.random.split(key, 4)

    # Small shapes consistent with the module:
    #   template z: (B, C, Hz, Wz), search x: (B, C, H, W)
    #   corr channels = Hz*Wz = 64, HW = 256.
    B, C = 2, 16
    Hz = Wz = 8
    H = W = 16

    z = jax.random.normal(k_z, (B, C, Hz, Wz), jnp.float32)
    x = jax.random.normal(k_x, (B, C, H, W), jnp.float32)

    # cat=False (module default) -- exercises the squeezed (block_b=1) path.
    out = jax.block_until_ready(fear_pwca(z, x, cat=False))
    ref = reference(z, x, cat=False)
    assert out.shape == (B, Hz * Wz, H, W)
    assert jnp.allclose(out, ref, atol=1e-4, rtol=1e-4), "mismatch (cat=False)"

    # cat=True path, concat fused inside the kernel.
    out_cat = jax.block_until_ready(fear_pwca(z, x, cat=True))
    ref_cat = reference(z, x, cat=True)
    assert out_cat.shape == (B, Hz * Wz + C, H, W)
    assert jnp.allclose(out_cat, ref_cat, atol=1e-4, rtol=1e-4), \
        "mismatch (cat=True)"

    # Exercise the batched (block_b > 1) kernel path as well.
    B2 = 4
    z2 = jax.random.normal(k_z2, (B2, C, Hz, Wz), jnp.float32)
    x2 = jax.random.normal(k_x2, (B2, C, H, W), jnp.float32)
    out2 = jax.block_until_ready(fear_pwca(z2, x2, cat=True, block_b=2))
    ref2 = reference(z2, x2, cat=True)
    assert jnp.allclose(out2, ref2, atol=1e-4, rtol=1e-4), \
        "mismatch (batched, cat=True)"

    print("KERNEL_OK")
</pallas_src>

<mosaic_0001>
module attributes {stable_mosaic.version = 11 : i64} {
  func.func @_pwca_kernel(%arg0: i32, %arg1: i32, %arg2: memref<1x16x64xf32, #tpu.memory_space<vmem>>, %arg3: memref<1x16x256xf32, #tpu.memory_space<vmem>>, %arg4: memref<1x64x256xf32, #tpu.memory_space<vmem>>) attributes {dimension_semantics = [#tpu.dimension_semantics<parallel>, #tpu.dimension_semantics<parallel>], iteration_bounds = array<i64: 2, 1>, scalar_prefetch = 0 : i64, scratch_operands = 0 : i64, tpu.core_type = #tpu.core_type<tc>, window_params = [{transform_indices = @transform_0, window_bounds = array<i64: 1, 16, 64>}, {transform_indices = @transform_1, window_bounds = array<i64: 1, 16, 256>}, {transform_indices = @transform_2, window_bounds = array<i64: 1, 64, 256>}]} {
    %c0 = arith.constant 0 : index
    %c0_0 = arith.constant 0 : index
    %c0_1 = arith.constant 0 : index
    %0 = vector.load %arg2[%c0, %c0_0, %c0_1] : memref<1x16x64xf32, #tpu.memory_space<vmem>>, vector<1x16x64xf32>
    %1 = vector.shape_cast %0 : vector<1x16x64xf32> to vector<16x64xf32>
    %c0_2 = arith.constant 0 : index
    %c0_3 = arith.constant 0 : index
    %c0_4 = arith.constant 0 : index
    %2 = vector.load %arg3[%c0_2, %c0_3, %c0_4] : memref<1x16x256xf32, #tpu.memory_space<vmem>>, vector<1x16x256xf32>
    %3 = vector.shape_cast %2 : vector<1x16x256xf32> to vector<16x256xf32>
    %cst = arith.constant dense<0.000000e+00> : vector<64x256xf32>
    %4 = tpu.matmul %1, %3, %cst {dimension_numbers = #tpu.dot_dimension_numbers<[0], [0], [1], [1], [0, 1, 1, 1], [], []>} : vector<16x64xf32>, vector<16x256xf32>, vector<64x256xf32> -> vector<64x256xf32>
    %c0_5 = arith.constant 0 : index
    %c0_6 = arith.constant 0 : index
    %c0_7 = arith.constant 0 : index
    %5 = vector.load %arg4[%c0_5, %c0_6, %c0_7] : memref<1x64x256xf32, #tpu.memory_space<vmem>>, vector<1x64x256xf32>
    %6 = vector.shape_cast %5 : vector<1x64x256xf32> to vector<64x256xf32>
    %7 = vector.shape_cast %4 : vector<64x256xf32> to vector<1x64x256xf32>
    tpu.vector_store %arg4[%c0_5, %c0_6, %c0_7], %7 {strides = array<i32>} : memref<1x64x256xf32, #tpu.memory_space<vmem>>, vector<1x64x256xf32>,
    return
  }
  func.func @transform_0(%arg0: i32, %arg1: i32) -> (i32, i32, i32) {
    %c0_i32 = arith.constant 0 : i32
    %c0_i32_0 = arith.constant 0 : i32
    %c0_i32_1 = arith.constant 0 : i32
    return %arg0, %c0_i32, %c0_i32_0 : i32, i32, i32
  }
  func.func @transform_1(%arg0: i32, %arg1: i32) -> (i32, i32, i32) {
    %c0_i32 = arith.constant 0 : i32
    %c0_i32_0 = arith.constant 0 : i32
    return %arg0, %c0_i32, %arg1 : i32, i32, i32
  }
  func.func @transform_2(%arg0: i32, %arg1: i32) -> (i32, i32, i32) {
    %c0_i32 = arith.constant 0 : i32
    %c0_i32_0 = arith.constant 0 : i32
    return %arg0, %c0_i32, %arg1 : i32, i32, i32
  }
}

</mosaic_0001>

<bundles_post_ra>
// kernel: tpu_custom_call.1
= control target key start
LH: loop header
LB: loop body
LE: loop exit
PB: predicated region body
PF: predicated region fallthrough
CT: control target
= control target key end

     0   :  { %s980_s0 = inlined_call_operand.hbm [shape: f32[2,16,64], index: 0, kind: input, shape index: {}]   ;;  %s981_s1 = inlined_call_operand.hbm [shape: f32[2,16,256], index: 1, kind: input, shape index: {}]   ;;  %s982_s2 = inlined_call_operand.hbm [shape: f32[2,64,256], index: 2, kind: output, shape index: {}]  }
   0x1   :  { %983 = sst [smem:[#allocation11_spill]] %s980_s0 }
   0x2   :  { %7 = vsyncpa [#allocation3], 0 }
   0x3   :  { %9 = vsyncpa [#allocation3 + $0x1], 0 }
   0x4   :  { %10 = vsyncpa [#allocation6], 0 }
   0x5   :  { %12 = vsyncpa [#allocation6 + $0x1], 0 }
   0x6   :  { %13 = vsyncpa [#allocation4], 0 }
   0x7   :  { %15 = vsyncpa [#allocation4 + $0x1], 0  ;;  %s800_s9 = smov 0   ;;  %s802_s10 = smov 0  }
   0x8   :  { %s804_s11 = smov 0   ;;  %s806_s12 = smov 0  }
   0x9   :  { %s808_s13 = smov 0   ;;  %s810_s14 = smov 0  }
   0xa LB: > { %s515_s15 = sadd.s32 4294967295, %s777_s14   ;;  %s516_s16 = sadd.s32 4294967294, %s777_s14   ;;  %s777_s14 = sphi %s810_s14, %s21_s14   ;;  %s773_s13 = sphi %s808_s13, %s994_s13   ;;  %s769_s12 = sphi %s806_s12, %s993_s12   ;;  %s765_s11 = sphi %s804_s11, %s992_s11   ;;  %s761_s10 = sphi %s802_s10, %s991_s10   ;;  %s757_s9 = sphi %s800_s9, %s990_s9  }
   0xb   : > { %s33_s17 = sadd.s32 1, %s773_s13  ;;  %s40_s18 = sadd.s32 1, %s765_s11 }
   0xc   : > { %p35_p0 = scmp.ge.s32.totalorder %s33_s17, 2  ;;  %p47_p1 = scmp.ne.s32.totalorder %s765_s11, %s761_s10 }
   0xd   : > { %p48_p2 = scmp.eq.s32.totalorder %s777_s14, 0  ;;  %p53_p3 = scmp.ne.s32.totalorder %s761_s10, %s757_s9 }
   0xe   : > { %s996_s17 = smov (%p35_p0, %s33_s17), 0  ;;  %p54_p5 = scmp.eq.s32.totalorder %s515_s15, 0 }
   0xf   : > { %p841_p4 = por %p48_p2, %p47_p1  ;;  %s37_s20 = ssub.s32 %s773_s13, %s996_s17 }
  0x10   : > { %p107_p6 = scmp.eq.s32.totalorder %s515_s15, 1  ;;  %p38_p7 = scmp.eq.s32.totalorder %s37_s20, 0 }
  0x11   : > { %p847_p8 = por %p54_p5, %p53_p3  ;;  %p113_p10 = scmp.eq.s32.totalorder %s516_s16, 1 }
  0x12   : > { %p851_p9 = por %p107_p6, %p47_p1  ;;  %p518_p12 = scmp.ge.s32.totalorder %s777_s14, 2 }
  0x13   : > { %s856_s23 = scalar_select %p38_p7, %s765_s11, %s40_s18  }
  0x14   : > { %p858_p11 = por %p113_p10, %p53_p3  ;;  %p574_p13 = scmp.lt.s32.totalorder %s777_s14, 2 }
  0x15   : > { %s865_s25 = sand.u32 1, %s765_s11   ;;  %s550_s27 = sshll.u32 %s773_s13, 4 }
  0x16   : > { %s519_s26 = sshll.u32 %s865_s25, 4  ;;  %s988_s0 = sld [smem:[#allocation11_spill]] }
  0x17   : > { %s137_s3 = scalar_lea.vmem [#allocation2], %s519_s26  ;;  %p874_p0 = pnand %p574_p13, %p841_p4 }
  0x18   : > { %s145_s4 = sshll.u32 %s137_s3, 4  ;;  %p525_p1 = scmp.ge.s32.totalorder %s777_s14, 1  ;;  %s146_s4 = int_to_ptr.vmem [resolvable:$true] %s145_s4 }
  0x19   : > { %s134_s7 = scalar_lea.sflag [#allocation3], %s865_s25  ;;  %s779_s8 = smov 128  }
  0x1a   : > { %s780_s15 = smov 8   ;;  %p177_p2 = scmp.lt.s32.totalorder %s777_s14, 3 }
  0x1b   : > { %s522_s16 = sshll.u32 %s865_s25, 5  ;;  %s551_s18 = sshll.u32 %s773_s13, 5 }
  0x1c   : > { %s142_s30 = scalar_lea.hbm %s988_s0, %s550_s27  ;;  %p178_p3 = pnand %p525_p1, %p177_p2 }
  0x1d   : > { %s143_s5 = sshll.u32 %s142_s30, 4  ;;  %s166_s19 = scalar_lea.hbm %s981_s1, %s551_s18  ;;  %s144_s5 = int_to_ptr.hbm [resolvable:$true] %s143_s5 }
  0x1e   : > { %566 = dma.hbm_to_vmem [thread:$0]  (!%p874_p0), %s144_s5, 256, %s146_s4, %s134_s7, %s779_s8, %s779_s8, %s780_s15  }
  0x1f   : > { %s159_s27 = scalar_lea.vmem [#allocation5], %s522_s16  ;;  %s167_s29 = sshll.u32 %s166_s19, 4  ;;  %s168_s29 = int_to_ptr.hbm [resolvable:$true] %s167_s29 }
  0x20   : > { %s169_s28 = sshll.u32 %s159_s27, 4  ;;  %s156_s30 = scalar_lea.sflag [#allocation6], %s865_s25  ;;  %s170_s28 = int_to_ptr.vmem [resolvable:$true] %s169_s28 }
  0x21   : > { %s781_s3 = smov 256   ;;  %s782_s0 = smov 16  }
  0x22   : > { %569 = dma.hbm_to_vmem [thread:$0]  (!%p874_p0), %s168_s29, 512, %s170_s28, %s156_s30, %s781_s3, %s781_s3, %s782_s0  }
  0x23   : > { %181 = sbr.rel (%p178_p3) target bundleno = 403 (0x193), region = 28  ;;  %s892_s4 = sand.u32 (!%p178_p3), 1, %s761_s10  }
  0x24   : > { %s526_s5 = sshll.u32 (!%p178_p3), %s892_s4, 4  ;;  %s184_s7 = scalar_lea.sflag (!%p178_p3), [#allocation3], %s892_s4 }
  0x25   : > { %s187_s8 = scalar_lea.vmem (!%p178_p3), [#allocation2], %s526_s5 }
  0x28   : > { %744 = dma.done.wait (%p847_p8), %s184_s7, 256  }
  0x29   : > { %746 = vsyncadd (%p847_p8), %s184_s7, 4294967040  ;;  %s527_s25 = sshll.u32 %s892_s4, 5  ;;  %s194_s0 = scalar_lea.sflag [#allocation6], %s892_s4 }
  0x2a   : > { %s197_s6 = scalar_lea.vmem [#allocation5], %s527_s25 }
  0x2b   : > { %748 = dma.done.wait (%p847_p8), %s194_s0, 512  }
  0x2c   : > { %750 = vsyncadd (%p847_p8), %s194_s0, 4294966784  ;;  %v226_v0 = vld [vmem:[%s187_s8] sm:$0xff]  ;;  %v231_v2 = vld [vmem:[%s197_s6 + $0x18] sm:$0xff]  ;;  %vm264_vm0 = vcmask 130048   ;;  %s528_s21 = sshll.u32 %s892_s4, 7  ;;  %s552_s16 = sshll.u32 %s769_s12, 7 }
  0x2d   : > { %v230_v1 = vld [vmem:[%s197_s6 + $0x10] sm:$0xff]  ;;  %232 = vxpose.xlu0.b32.start [1/2] (short) (narrow) %v226_v0, 64  ;;  %v228_v3 = vld [vmem:[%s197_s6] sm:$0xff]  ;;  %v229_v4 = vld [vmem:[%s197_s6 + $0x8] sm:$0xff]  ;;  %344 = vmatpush.msra.mxu1 %v231_v2  ;;  %s923_s15 = scalar_lea.vmem [#allocation7], %s528_s21  ;;  %s401_s26 = scalar_lea.hbm %s982_s2, %s552_s16 }
  0x2e   : > { %303 = vmatpush.msra.mxu0 %v230_v1  ;;  %553 = vmatpush.msra.mxu2 %v230_v1  ;;  %v227_v5 = vld [vmem:[%s187_s8 + $0x8] sm:$0xff]  ;;  %s402_s19 = sshll.u32 %s923_s15, 4  ;;  %s404_s27 = sshll.u32 %s401_s26, 4  ;;  %s403_s19 = int_to_ptr.vmem [resolvable:$true] %s402_s19  ;;  %s405_s27 = int_to_ptr.hbm [resolvable:$true] %s404_s27 }
  0x2f   : > { %555 = vmatpush.msra.mxu3 %v231_v2  ;;  %345 = vmatpush.msra.mxu1 %v229_v4  ;;  %s388_s28 = scalar_lea.sflag [#allocation4], %s892_s4  ;;  %s705_s29 = sshra.s32 %s405_s27, 4  ;;  %s706_s29 = int_to_ptr.hbm [resolvable:$true] %s705_s29 }
  0x30   : > { %304 = vmatpush.msra.mxu0 %v228_v3  ;;  %554 = vmatpush.msra.mxu2 %v228_v3  ;;  %s707_s12 = scalar_lea.hbm %s706_s29, 128  ;;  %s711_s5 = scalar_lea.hbm %s982_s2, 256 }
  0x31   : > { %556 = vmatpush.msra.mxu3 %v229_v4  ;;  %p708_p4 = scmp.ne.s32.totalorder %s706_s29, %s707_s12  ;;  %p712_p7 = scmp.lt.s32.totalorder %s706_s29, %s982_s2 }
  0x32   : > { %p713_p8 = scmp.lt.s32.totalorder %s711_s5, %s707_s12 }
  0x33   : > { %p709_p5 = pnand %p708_p4, %p851_p9 }
  0x34   : > { %p714_p10 = por %p713_p8, %p712_p7 }
  0x35   : > { %233 = vxpose.xlu0.b32.end [2/2] (short) (narrow) %v227_v5, 64  ;;  %p710_p6 = pneg %p709_p5 }
  0x37   : > { %p715_p13 = pnand %p714_p10, %p710_p6 }
  0xd1   : > { %v248_v6 = vpop.trf.xlu0 }
  0xd2   : > { %529 = vmatmul.msk.f32.vlgmr.msra.gmra.mxu0 %vm264_vm0, %v248_v6  ;;  %537 = vmatmul.msk.f32.vlgmr.msra.gmra.mxu1 %vm264_vm0, %v248_v6 }
  0xd9   : > { %v249_v7 = vpop.trf.xlu0 }
  0xda   : > { %530 = vmatmul.msk.f32.gmra.mxu0 %vm264_vm0, %v249_v7  ;;  %538 = vmatmul.msk.f32.gmra.mxu1 %vm264_vm0, %v249_v7 }
  0xe1   : > { %v250_v8 = vpop.trf.xlu0 }
  0xe2   : > { %531 = vmatmul.msk.f32.gmra.mxu0 %vm264_vm0, %v250_v8  ;;  %539 = vmatmul.msk.f32.gmra.mxu1 %vm264_vm0, %v250_v8 }
  0xe9   : > { %v251_v9 = vpop.trf.xlu0 }
  0xea   : > { %532 = vmatmul.msk.f32.gmra.mxu0 %vm264_vm0, %v251_v9  ;;  %540 = vmatmul.msk.f32.gmra.mxu1 %vm264_vm0, %v251_v9 }
  0xf1   : > { %v252_v10 = vpop.trf.xlu0 }
  0xf2   : > { %533 = vmatmul.msk.f32.vlgmr.msra.gmra.mxu2 %vm264_vm0, %v252_v10  ;;  %541 = vmatmul.msk.f32.vlgmr.msra.gmra.mxu3 %vm264_vm0, %v252_v10 }
  0xf9   : > { %v253_v11 = vpop.trf.xlu0 }
  0xfa   : > { %534 = vmatmul.msk.f32.gmra.mxu2 %vm264_vm0, %v253_v11  ;;  %542 = vmatmul.msk.f32.gmra.mxu3 %vm264_vm0, %v253_v11 }
 0x101   : > { %v254_v12 = vpop.trf.xlu0 }
 0x102   : > { %535 = vmatmul.msk.f32.gmra.mxu2 %vm264_vm0, %v254_v12  ;;  %543 = vmatmul.msk.f32.gmra.mxu3 %vm264_vm0, %v254_v12 }
 0x109   : > { %v255_v13 = vpop.trf.xlu0 }
 0x10a   : > { %536 = vmatmul.msk.f32.gmra.mxu2 %vm264_vm0, %v255_v13  ;;  %544 = vmatmul.msk.f32.gmra.mxu3 %vm264_vm0, %v255_v13 }
 0x14f   : > { %v306_v14 = vpop.f32.mrf.mxu0  ;;  %v347_v15 = vpop.f32.mrf.mxu1 }
 0x150   : > { %371 = vst [vmem:[%s923_s15] sm:$0xff] %v306_v14 }
 0x151   : > { %372 = vst [vmem:[%s923_s15 + $0x8] sm:$0xff] %v347_v15 }
 0x157   : > { %v309_v16 = vpop.f32.mrf.mxu0  ;;  %v350_v17 = vpop.f32.mrf.mxu1 }
 0x158   : > { %373 = vst [vmem:[%s923_s15 + $0x10] sm:$0xff] %v309_v16 }
 0x159   : > { %374 = vst [vmem:[%s923_s15 + $0x18] sm:$0xff] %v350_v17 }
 0x15f   : > { %v312_v18 = vpop.f32.mrf.mxu0  ;;  %v353_v19 = vpop.f32.mrf.mxu1 }
 0x160   : > { %375 = vst [vmem:[%s923_s15 + $0x20] sm:$0xff] %v312_v18 }
 0x161   : > { %376 = vst [vmem:[%s923_s15 + $0x28] sm:$0xff] %v353_v19 }
 0x167   : > { %v315_v20 = vpop.f32.mrf.mxu0  ;;  %v356_v21 = vpop.f32.mrf.mxu1 }
 0x168   : > { %377 = vst [vmem:[%s923_s15 + $0x30] sm:$0xff] %v315_v20 }
 0x169   : > { %378 = vst [vmem:[%s923_s15 + $0x38] sm:$0xff] %v356_v21 }
 0x175   : > { %v318_v22 = vpop.f32.mrf.mxu2  ;;  %v359_v23 = vpop.f32.mrf.mxu3 }
 0x176   : > { %379 = vst [vmem:[%s923_s15 + $0x40] sm:$0xff] %v318_v22 }
 0x177   : > { %380 = vst [vmem:[%s923_s15 + $0x48] sm:$0xff] %v359_v23 }
 0x17d   : > { %v321_v24 = vpop.f32.mrf.mxu2  ;;  %v362_v25 = vpop.f32.mrf.mxu3 }
 0x17e   : > { %381 = vst [vmem:[%s923_s15 + $0x50] sm:$0xff] %v321_v24 }
 0x17f   : > { %382 = vst [vmem:[%s923_s15 + $0x58] sm:$0xff] %v362_v25 }
 0x185   : > { %v324_v26 = vpop.f32.mrf.mxu2  ;;  %v365_v27 = vpop.f32.mrf.mxu3 }
 0x186   : > { %383 = vst [vmem:[%s923_s15 + $0x60] sm:$0xff] %v324_v26 }
 0x187   : > { %384 = vst [vmem:[%s923_s15 + $0x68] sm:$0xff] %v365_v27 }
 0x18d   : > { %v327_v28 = vpop.f32.mrf.mxu2  ;;  %v368_v29 = vpop.f32.mrf.mxu3 }
 0x18e   : > { %385 = vst [vmem:[%s923_s15 + $0x70] sm:$0xff] %v327_v28 }
 0x18f   : > { %386 = vst [vmem:[%s923_s15 + $0x78] sm:$0xff] %v368_v29 }
 0x190   : > { %718 = shalt.err (!%p715_p13)
}
 0x191   : > { %s783_s4 = smov 256   ;;  %s784_s25 = smov 16  }
 0x192   : > { %561 = dma.vmem_to_hbm [thread:$0]  (%p851_p9), %s403_s19, 2048, %s405_s27, %s388_s28, %s783_s4, %s783_s4, %s784_s25  }
 0x193 PF: > { %s419_s0 = sand.u32 1, %s757_s9   ;;  %p571_p0 = pnand %p518_p12, %p858_p11 }
 0x194   : > { %s420_s6 = scalar_lea.sflag [#allocation4], %s419_s0 }
 0x195   : > { %p572_p1 = pneg %p571_p0 }
 0x197   : > { %752 = dma.done.wait (%p572_p1), %s420_s6, 2048  }
 0x198   : > { %754 = vsyncadd (%p572_p1), %s420_s6, 4294965248  ;;  %s21_s14 = sadd.s32 1, %s777_s14   ;;  %s990_s9 = smov %s761_s10 }
 0x199   : > { %p18_p2 = scmp.ge.s32.totalorder %s21_s14, 4   ;;  %s991_s10 = smov %s765_s11 }
 0x19a   : > { %s992_s11 = smov %s856_s23  ;;  %s993_s12 = smov %s773_s13 }
 0x19b   : > { %s994_s13 = smov %s996_s17  ;;  %20 = sbr.rel (!%p18_p2) target bundleno = 10 (0xa), region = 86 }
 0x1a0   :  { %426 = vsyncpa [#allocation3], 1 }
 0x1a1   :  { %428 = vsyncpa [#allocation3 + $0x1], 1 }
 0x1a2   :  { %429 = vsyncpa [#allocation6], 1 }
 0x1a3   :  { %431 = vsyncpa [#allocation6 + $0x1], 1 }
 0x1a4   :  { %432 = vsyncpa [#allocation4], 1 }
 0x1a5   :  { %434 = vsyncpa [#allocation4 + $0x1], 1 }

</bundles_post_ra>
